<compile_context>
chip_gen: v6e
topology: v6e:2x2x1
jax: 0.10.0
libtpu: 0.0.40
codegen_flags: <defaults>
</compile_context>

<pallas_src>
import functools
import math

import numpy as np
import jax
import jax.numpy as jnp
from jax.experimental import pallas as pl
from jax.experimental.pallas import tpu as pltpu


def make_svls_kernel_3d(kernel_size=3, sigma=1.0):
    """Replicates torch get_svls_filter_3d kernel construction (float32)."""
    k = kernel_size
    coords = np.arange(k, dtype=np.float64)
    zz, yy, xx = np.meshgrid(coords, coords, coords, indexing="ij")
    mean = (k - 1) / 2.0
    variance = float(sigma) ** 2.0
    sq = (xx - mean) ** 2 + (yy - mean) ** 2 + (zz - mean) ** 2
    g = (1.0 / (2.0 * math.pi * variance + 1e-16)) * np.exp(
        -sq / (2.0 * variance + 1e-16))
    g = g / g.sum()
    c = 1  # torch code hard-codes index [1, 1, 1]
    neighbors_sum = 1.0 - g[c, c, c]
    g[c, c, c] = neighbors_sum
    svls = g / neighbors_sum
    return svls.astype(np.float32)


def _svls_separable_constants(sigma=1.0):
    """1-D gaussian taps + center-tap fixup that reproduce the torch SVLS filter
    including the trailing division by svls_kernel.sum() (== 2)."""
    e = math.exp(-1.0 / (2.0 * float(sigma) ** 2 + 1e-16))
    g1_edge = e / (1.0 + 2.0 * e)          # normalized 1-D gaussian, offset +/-1
    g1_mid = 1.0 / (1.0 + 2.0 * e)         # normalized 1-D gaussian, offset 0
    g_c = g1_mid ** 3                      # 3-D gaussian center weight
    scale = 1.0 / (2.0 * (1.0 - g_c))      # off-center taps: g / (2 * (1 - g_c))
    delta = (1.0 - 2.0 * g_c) / (2.0 * (1.0 - g_c))  # makes the center tap 1/2
    return g1_edge, g1_mid, scale, delta


@functools.cache
def _lane_roll_sign():
    """+1 if pltpu.roll(x, s, axis=1) follows jnp.roll semantics, else -1."""
    def probe(x_ref, o_ref):
        o_ref[...] = pltpu.roll(x_ref[...], 1, 1)

    x = jnp.broadcast_to(jnp.arange(128, dtype=jnp.int32), (8, 128))
    y = pl.pallas_call(
        probe, out_shape=jax.ShapeDtypeStruct((8, 128), jnp.int32))(x)
    return 1 if int(y[0, 0]) == 127 else -1


@functools.cache
def _sublane_roll_sign(rows):
    """+1/-1 if pltpu.roll along axis 0 lowers for a `rows`-row plane (sign that
    matches jnp.roll), or 0 if unsupported (slice fallback is used instead)."""
    try:
        def probe(x_ref, o_ref):
            o_ref[...] = pltpu.roll(x_ref[...], 1, 0)

        x = jnp.broadcast_to(
            jnp.arange(rows, dtype=jnp.int32)[:, None], (rows, 256))
        y = pl.pallas_call(
            probe, out_shape=jax.ShapeDtypeStruct((rows, 256), jnp.int32))(x)
        v = int(y[0, 0])
        if v == rows - 1:
            return 1
        if v == 1:
            return -1
        return 0
    except Exception:
        return 0


def _vmem_capacity_bytes():
    try:
        return int(pltpu.get_tpu_info().vmem_capacity_bytes)
    except Exception:
        return 64 << 20   # conservative (v7x-sized) fallback


def _plan_tiling(D, classes, hw_pad, batch):
    """Pick d_chunk (divides D, %8==0 or ==D) using generation-aware VMEM budget
    that accounts for pipeline buffers AND the in-kernel f32 temporaries."""
    vmem_cap = _vmem_capacity_bytes()
    budget = (vmem_cap * 3) // 4

    cands = [c for c in range(1, D + 1)
             if D % c == 0 and (c == D or c % 8 == 0)]
    if batch == 1 and D > 1:
        # Keep >= 2 grid steps along a "parallel" axis so dual-TC chips (v7x)
        # don't leave one core idle for single-batch calls.
        halved = [c for c in cands if c <= D // 2]
        if halved:
            cands = halved

    def est_bytes(c):
        plane = (c + 2) * hw_pad * 4                 # one f32/int32 halo plane
        out_blk = classes * c * hw_pad * 4
        # 2x double-buffered output + 2x double-buffered label window
        # + ~12 live halo planes of unrolled-class temporaries + misc headroom.
        return 2 * out_blk + 2 * plane + 12 * plane + (2 << 20)

    fitting = [c for c in cands if est_bytes(c) <= budget]
    d_chunk = max(fitting) if fitting else min(cands)
    vmem_limit = int(max(32 << 20,
                         min(est_bytes(d_chunk) + (8 << 20),
                             vmem_cap - (8 << 20))))
    return d_chunk, vmem_limit


def svls_forward(labels, classes=4, sigma=1.0, kernel_size=3):
    """SVLS forward. labels: (b, d, h, w) int. Returns (b, classes, d, h, w) f32."""
    if kernel_size != 3:
        raise NotImplementedError(
            "Pallas SVLS kernel supports kernel_size=3 (the torch module "
            "hard-codes the center index [1,1,1]).")

    b, d, h, w = labels.shape
    D, H, W = int(d), int(h), int(w)
    HW = H * W
    HW_pad = ((HW + 127) // 128) * 128     # lane-dense output (unmasked stores)

    g1_edge, g1_mid, scale, delta = _svls_separable_constants(sigma)
    wd_edge = scale * g1_edge              # 1/ksum + off-center scale folded in
    wd_mid = scale * g1_mid

    d_chunk, vmem_limit = _plan_tiling(D, classes, HW_pad, b)
    n_dz = D // d_chunk
    R = d_chunk + 2                        # halo window rows along D

    # ---- tiny int32 preprocessing (no f32 expansion in HBM) ----
    lab = labels.astype(jnp.int32).reshape(b, D, HW)
    if HW_pad != HW:
        lab = jnp.pad(lab, ((0, 0), (0, 0), (0, HW_pad - HW)))
    lab = jnp.pad(lab, ((0, 0), (1, 1), (0, 0)), mode="edge")    # D replicate-halo
    # Pre-materialize overlapping D-chunks so the BlockSpec tiles D directly:
    # only a (d_chunk+2, HW_pad) int32 window is VMEM-resident per grid step.
    starts = np.arange(n_dz, dtype=np.int64) * d_chunk
    idx = starts[:, None] + np.arange(R, dtype=np.int64)[None, :]
    lab_chunks = lab[:, idx, :]                                  # (b, n_dz, R, HW_pad)

    # Host-built per-lane w coordinate (avoids vector integer mod in-kernel).
    wpos_np = np.tile(np.arange(W, dtype=np.int32), H)
    wpos_np = np.pad(wpos_np, (0, HW_pad - HW)).reshape(1, HW_pad)
    wpos = jnp.asarray(wpos_np)

    lane_sign = _lane_roll_sign()
    sub_sign = _sublane_roll_sign(R)

    def shift(x, k):
        # jnp.roll(x, k, axis=1): y[:, j] = x[:, j - k]. Wrap-around lanes are
        # overwritten by the replicate-boundary selects below.
        return pltpu.roll(x, (lane_sign * k) % HW_pad, 1)

    def shift_rows(x, k):
        # jnp.roll(x, k, axis=0): y[r, :] = x[r - k, :]. Wrapped halo rows are
        # never stored.
        return pltpu.roll(x, (sub_sign * k) % R, 0)

    def svls_kernel(wpos_ref, lab_ref, out_ref):
        lab_s = lab_ref[0, 0]                                    # (R, HW_pad) int32

        lane = jax.lax.broadcasted_iota(jnp.int32, (1, HW_pad), 1)
        w_idx = wpos_ref[...]                                    # (1, HW_pad) int32
        w_first = w_idx == 0
        w_last = w_idx == (W - 1)
        h_first = lane < W
        h_last = lane >= (HW - W)

        # classes is small (typically 4); statically unrolled. The vmem_limit
        # budget above reserves ~12 live halo planes for these temporaries.
        for c in range(classes):
            oh = (lab_s == c).astype(jnp.float32)                # fused one-hot

            # --- D pass (factored edge weight; normalization folded in) ---
            if sub_sign != 0:
                # Sublane rolls (XLU, has slack) on the full halo plane: no
                # misaligned slice copies; halo rows ride through the
                # lane-local H/W passes and are dropped at the store.
                t = (wd_edge * (shift_rows(oh, 1) + shift_rows(oh, -1))
                     + wd_mid * oh)
                fix = oh
            else:
                # Fallback: sublane-offset slices (materialize copies).
                fix = oh[1:d_chunk + 1, :]
                t = (wd_edge * (oh[0:d_chunk, :] + oh[2:d_chunk + 2, :])
                     + wd_mid * fix)

            # --- H pass: +/-W lanes within the flattened H*W plane row ---
            h_lo = jnp.where(h_first, t, shift(t, W))            # value from h-1
            h_hi = jnp.where(h_last, t, shift(t, -W))            # value from h+1
            t = g1_mid * t + g1_edge * (h_lo + h_hi)

            # --- W pass: +/-1 lane, replicate at every image-row boundary ---
            w_lo = jnp.where(w_first, t, shift(t, 1))            # value from w-1
            w_hi = jnp.where(w_last, t, shift(t, -1))            # value from w+1
            t = g1_mid * t + g1_edge * (w_lo + w_hi)

            # --- SVLS center-tap fixup (center weight becomes exactly 1/2) ---
            res = t + delta * fix
            if sub_sign != 0:
                res = res[1:d_chunk + 1, :]                      # single interior slice
            out_ref[0, c, :, :] = res

    out = pl.pallas_call(
        svls_kernel,
        out_shape=jax.ShapeDtypeStruct((b, classes, D, HW_pad), jnp.float32),
        grid_spec=pltpu.PrefetchScalarGridSpec(
            num_scalar_prefetch=0,
            grid=(b, n_dz),
            in_specs=[
                pl.BlockSpec((1, HW_pad), lambda ib, iz: (0, 0)),            # wpos
                pl.BlockSpec((1, 1, R, HW_pad),
                             lambda ib, iz: (ib, iz, 0, 0)),                 # label halo window
            ],
            out_specs=pl.BlockSpec((1, classes, d_chunk, HW_pad),
                                   lambda ib, iz: (ib, 0, iz, 0)),
        ),
        compiler_params=pltpu.CompilerParams(
            dimension_semantics=("parallel", "parallel"),
            vmem_limit_bytes=vmem_limit,
        ),
    )(wpos, lab_chunks)

    if HW_pad != HW:
        out = out[..., :HW]
    return out.reshape(b, classes, D, H, W)


def svls_reference(labels, classes=4, sigma=1.0, kernel_size=3):
    """Pure-JAX reference (direct 27-tap conv, same math as the torch module)."""
    w3 = make_svls_kernel_3d(kernel_size=kernel_size, sigma=sigma)
    ksum = float(w3.sum())
    b, d, h, w = labels.shape
    oh = (labels[..., None] == jnp.arange(classes, dtype=labels.dtype)
          ).astype(jnp.float32)
    x = jnp.transpose(oh, (0, 4, 1, 2, 3))
    xpad = jnp.pad(x, ((0, 0), (0, 0), (1, 1), (1, 1), (1, 1)), mode="edge")
    acc = jnp.zeros((b, classes, d, h, w), jnp.float32)
    for kd in range(kernel_size):
        for kh in range(kernel_size):
            for kw in range(kernel_size):
                acc = acc + float(w3[kd, kh, kw]) * \
                    xpad[:, :, kd:kd + d, kh:kh + h, kw:kw + w]
    return acc / ksum


if __name__ == "__main__":
    key = jax.random.PRNGKey(0)
    b, classes, d, h, w = 2, 4, 8, 16, 16
    labels = jax.random.randint(key, (b, d, h, w), 0, classes, dtype=jnp.int32)

    out = svls_forward(labels, classes=classes, sigma=1.0, kernel_size=3)
    out = jax.block_until_ready(out)

    ref = svls_reference(labels, classes=classes, sigma=1.0, kernel_size=3)
    ref = jax.block_until_ready(ref)

    assert out.shape == (b, classes, d, h, w), out.shape
    assert np.allclose(np.asarray(out), np.asarray(ref), atol=1e-5), \
        "Pallas SVLS output mismatch vs reference"
    print("KERNEL_OK")
</pallas_src>

<mosaic_0001>
module attributes {stable_mosaic.version = 11 : i64} {
  func.func @probe(%arg0: memref<8x128xi32, #tpu.memory_space<vmem>>, %arg1: memref<8x128xi32, #tpu.memory_space<vmem>>) attributes {dimension_semantics = [], scalar_prefetch = 0 : i64, scratch_operands = 0 : i64, tpu.core_type = #tpu.core_type<tc>} {
    %c0 = arith.constant 0 : index
    %c0_0 = arith.constant 0 : index
    %0 = vector.load %arg0[%c0, %c0_0] : memref<8x128xi32, #tpu.memory_space<vmem>>, vector<8x128xi32>
    %c1_i32 = arith.constant 1 : i32
    %1 = tpu.dynamic_rotate %0 by %c1_i32 dim 1 : vector<8x128xi32>, i32 -> vector<8x128xi32>
    %c0_1 = arith.constant 0 : index
    %c0_2 = arith.constant 0 : index
    %2 = vector.load %arg1[%c0_1, %c0_2] : memref<8x128xi32, #tpu.memory_space<vmem>>, vector<8x128xi32>
    tpu.vector_store %arg1[%c0_1, %c0_2], %1 {strides = array<i32>} : memref<8x128xi32, #tpu.memory_space<vmem>>, vector<8x128xi32>,
    return
  }
}

</mosaic_0001>

<bundles_post_ra>
// kernel: tpu_custom_call.1
= control target key start
LH: loop header
LB: loop body
LE: loop exit
PB: predicated region body
PF: predicated region fallthrough
CT: control target
= control target key end

     0   :  { %6 = vsyncpa [#allocation3], 0  ;;  %s106_s0 = inlined_call_operand.hbm [shape: s32[8,128], index: 0, kind: input, shape index: {}]   ;;  %s107_s1 = inlined_call_operand.hbm [shape: s32[8,128], index: 1, kind: output, shape index: {}]  }
   0x1   :  { %7 = vsyncpa [#allocation4], 0  ;;  %s87_s6 = smov [#allocation2]  }
   0x2   :  { %s14_s7 = sshll.u32 %s87_s6, 4  ;;  %s15_s7 = int_to_ptr.vmem [resolvable:$true] %s14_s7 }
   0x3   :  { %s51_s8 = scalar_lea.vmem %s15_s7, 128  ;;  %p56_p1 = scmp.lt.s32.totalorder %s15_s7, %s15_s7 }
   0x4   :  { %p52_p0 = scmp.ne.s32.totalorder %s15_s7, %s51_s8  ;;  %p57_p2 = scmp.lt.s32.totalorder %s51_s8, %s51_s8 }
   0x6   :  { %p58_p3 = por %p57_p2, %p56_p1 }
   0x8   :  { %p59_p4 = pnand %p58_p3, %p52_p0 }
   0xa   :  { %62 = shalt.err (!%p59_p4)
}
   0xb   :  { %17 = dma.hbm_to_vmem [thread:$0]  %s106_s0, 128, %s15_s7, [#allocation3]  }
   0xc   :  { %83 = dma.done.wait [#allocation3], 128  }
   0xd   :  { %84 = vsyncadd [#allocation3], 4294967168  ;;  %v21_v0 = vld [vmem:[#allocation2] sm:$0xff]  ;;  %s88_s11 = smov 1   ;;  %s89_s12 = smov [#allocation5]  }
   0xe   :  { %22 = vrot.lane.b32.xlu0 %v21_v0, %s88_s11  ;;  %s31_s13 = sshll.u32 %s89_s12, 4  ;;  %s32_s13 = int_to_ptr.vmem [resolvable:$true] %s31_s13 }
   0xf   :  { %s63_s14 = scalar_lea.vmem %s32_s13, 128  ;;  %p68_p6 = scmp.lt.s32.totalorder %s32_s13, %s32_s13 }
  0x10   :  { %p64_p5 = scmp.ne.s32.totalorder %s32_s13, %s63_s14  ;;  %p69_p7 = scmp.lt.s32.totalorder %s63_s14, %s63_s14 }
  0x12   :  { %p70_p8 = por %p69_p7, %p68_p6 }
  0x14   :  { %p71_p9 = pnand %p70_p8, %p64_p5 }
  0x80   :  { %v23_v1 = vpop.permute.xlu0 %22 }
  0x81   :  { %24 = vst [vmem:[#allocation5] sm:$0xff] %v23_v1 }
  0x82   :  { %74 = shalt.err (!%p71_p9)
}
  0x83   :  { %34 = dma.vmem_to_hbm [thread:$0]  %s32_s13, 128, %s107_s1, [#allocation4]  }
  0x84   :  { %85 = dma.done.wait [#allocation4], 128  }
  0x85   :  { %86 = vsyncadd [#allocation4], 4294967168 }
  0x86   :  { %38 = vsyncpa [#allocation3], 1 }
  0x87   :  { %39 = vsyncpa [#allocation4], 1 }

</bundles_post_ra>
